<compile_context>
chip_gen: v7x
topology: tpu7x:2x2x1
jax: 0.10.0
libtpu: 0.0.40
codegen_flags: <defaults>
</compile_context>

<pallas_src>
import jax
import jax.numpy as jnp
from jax.experimental import pallas as pl
from jax.experimental.pallas import tpu as pltpu


def _round_up(x, m):
    return (x + m - 1) // m * m


def _make_kernel(K, Cin, Cout, Wp, M_pad, stride):
    def kernel(xf_ref, w_ref, b_ref, o_ref, rhs_ref):
        # xf_ref : (1, stride, Cin, L_pad)  bf16  row-parity-split padded rasters
        # w_ref  : (Cout, K*K*Cin)          bf16  tap-major flattened weights
        # b_ref  : (Cout, 1)                f32
        # o_ref  : (1, Cout, M_pad)         bf16  row-decimated output raster
        # rhs_ref: (K*K*Cin, M_pad)         bf16  VMEM scratch (stacked taps)
        for kh in range(K):                 # K*K = 9: fully unrolled static loop
            par = kh % stride               # which row-parity raster
            row = kh // stride              # row offset inside that raster
            for kw in range(K):
                t = kh * K + kw
                off = row * Wp + kw         # static lane offset
                rhs_ref[t * Cin:(t + 1) * Cin, :] = \
                    xf_ref[0, par, :, off:off + M_pad]
        # Single contraction-(K*K*Cin) GEMM replaces 9 tiny matmuls + 8
        # f32 accumulate passes.
        acc = jnp.dot(w_ref[...], rhs_ref[...],
                      preferred_element_type=jnp.float32)
        o_ref[0] = (acc + b_ref[...]).astype(o_ref.dtype)
    return kernel


def conv_layer_forward(x, weight, bias, stride):
    """Equivalent of ConvLayer.forward: ReplicationPad2d(K//2) -> Conv2d(K, stride).

    x: (N, Cin, H, W) NCHW, weight: (Cout, Cin, K, K) OIHW, bias: (Cout,).
    """
    N, Cin, H, W = x.shape
    Cout, Cin_w, K, K2 = weight.shape
    assert Cin == Cin_w and K == K2
    pad = K // 2

    # Replication ("edge") padding — the only per-pixel glue copy (~1.3x).
    xp = jnp.pad(x.astype(jnp.bfloat16),
                 ((0, 0), (0, 0), (pad, pad), (pad, pad)), mode="edge")
    Hp, Wp = H + 2 * pad, W + 2 * pad
    W1 = Wp - K + 1                          # stride-1 column count per row
    Ho = (Hp - K) // stride + 1
    Wo = (Wp - K) // stride + 1

    # Split input rows by parity (input row h -> raster h % stride, row
    # h // stride) so in-kernel row decimation is a contiguous lane slice.
    Hq = -(-Hp // stride)                    # rows per parity raster
    Hp_s = Hq * stride
    if Hp_s != Hp:
        xp = jnp.pad(xp, ((0, 0), (0, 0), (0, Hp_s - Hp), (0, 0)))
    xpar = xp.reshape(N, Cin, Hq, stride, Wp).transpose(0, 3, 1, 2, 4)
    xpar = xpar.reshape(N, stride, Cin, Hq * Wp)

    # Row-decimated output raster: Ho rows of Wp stride-1 columns.  The last
    # K-1 columns of each row are junk (reads wrap into the next parity row)
    # and are cropped in glue.
    M = Ho * Wp
    M_pad = _round_up(M, 128)                # lane-dense, unmasked stores
    off_max = ((K - 1) // stride) * Wp + (K - 1)
    L_pad = _round_up(max(Hq * Wp, off_max + M_pad), 128)
    xf = jnp.pad(xpar, ((0, 0), (0, 0), (0, 0), (0, L_pad - Hq * Wp)))

    # Tap-major flattened weights matching the stacked-RHS layout:
    # w2[co, (kh*K+kw)*Cin + ci] = weight[co, ci, kh, kw].
    w2 = weight.transpose(0, 2, 3, 1).reshape(Cout, K * K * Cin)
    w2 = w2.astype(jnp.bfloat16)
    bvec = bias.reshape(Cout, 1).astype(jnp.float32)

    # Explicit VMEM budget: double-buffered in/out blocks + single scratch,
    # capped with headroom below v7x's 64 MiB physical VMEM per TensorCore.
    in_b = stride * Cin * L_pad * 2
    out_b = Cout * M_pad * 2
    w_b = Cout * K * K * Cin * 2 + Cout * 4
    scratch_b = K * K * Cin * M_pad * 2
    needed = 2 * (in_b + out_b + w_b) + scratch_b
    vmem_cap = 48 * 1024 * 1024
    if needed + (2 << 20) > vmem_cap:
        # TODO(synk): row-tiled M grid axis / manual overlapping-window DMA
        # double-buffer for images whose raster does not fit one-per-step.
        raise NotImplementedError(
            "ConvLayer Pallas kernel: image too large for the single-block "
            "per-image plan; needs the row-tiled path.")
    vmem_limit = int(min(vmem_cap, max(4 * 1024 * 1024, 2 * needed)))

    kernel = _make_kernel(K, Cin, Cout, Wp, M_pad, stride)

    out_raster = pl.pallas_call(
        kernel,
        out_shape=jax.ShapeDtypeStruct((N, Cout, M_pad), jnp.bfloat16),
        grid=(N,),
        in_specs=[
            pl.BlockSpec((1, stride, Cin, L_pad), lambda n: (n, 0, 0, 0)),
            pl.BlockSpec((Cout, K * K * Cin), lambda n: (0, 0)),
            pl.BlockSpec((Cout, 1), lambda n: (0, 0)),
        ],
        out_specs=pl.BlockSpec((1, Cout, M_pad), lambda n: (n, 0, 0)),
        scratch_shapes=[pltpu.VMEM((K * K * Cin, M_pad), jnp.bfloat16)],
        compiler_params=pltpu.CompilerParams(
            dimension_semantics=("parallel",),
            vmem_limit_bytes=vmem_limit,
        ),
    )(xf, w2, bvec)

    # Crop per-row junk columns and apply the column stride; output rows were
    # already decimated in-kernel.
    out = out_raster[:, :, :M].reshape(N, Cout, Ho, Wp)[:, :, :, :W1:stride]
    assert out.shape == (N, Cout, Ho, Wo)
    return out.astype(jnp.float32)


def _reference(x, weight, bias, stride):
    pad = weight.shape[-1] // 2
    xp = jnp.pad(x, ((0, 0), (0, 0), (pad, pad), (pad, pad)), mode="edge")
    y = jax.lax.conv_general_dilated(
        xp.astype(jnp.float32), weight.astype(jnp.float32),
        window_strides=(stride, stride), padding="VALID",
        dimension_numbers=("NCHW", "OIHW", "NCHW"))
    return y + bias.reshape(1, -1, 1, 1)


if __name__ == "__main__":
    # Module config: in_channels=4, out_channels=8, kernel_size=3
    in_channels, out_channels, kernel_size = 4, 8, 3
    N, H, W = 2, 16, 16

    key = jax.random.PRNGKey(0)
    kx, kw_, kb = jax.random.split(key, 3)
    x = jax.random.normal(kx, (N, in_channels, H, W), dtype=jnp.float32)
    weight = jax.random.normal(
        kw_, (out_channels, in_channels, kernel_size, kernel_size),
        dtype=jnp.float32) * 0.1
    bias = jax.random.normal(kb, (out_channels,), dtype=jnp.float32) * 0.1

    ok = True
    for stride in (1, 2):
        y = conv_layer_forward(x, weight, bias, stride)
        y = jax.block_until_ready(y)
        y_ref = _reference(x, weight, bias, stride)
        if y.shape != y_ref.shape or not bool(
                jnp.allclose(y, y_ref, atol=2e-2, rtol=2e-2)):
            ok = False

    if ok:
        print("KERNEL_OK")
</pallas_src>

<mosaic_0001>
module attributes {stable_mosaic.version = 11 : i64} {
  func.func @kernel(%arg0: i32, %arg1: memref<1x1x4x512xbf16, #tpu.memory_space<vmem>>, %arg2: memref<8x36xbf16, #tpu.memory_space<vmem>>, %arg3: memref<8x1xf32, #tpu.memory_space<vmem>>, %arg4: memref<1x8x384xbf16, #tpu.memory_space<vmem>>, %arg5: memref<36x384xbf16, #tpu.memory_space<vmem>>) attributes {dimension_semantics = [#tpu.dimension_semantics<parallel>], iteration_bounds = array<i64: 2>, scalar_prefetch = 0 : i64, scratch_operands = 1 : i64, tpu.core_type = #tpu.core_type<tc>, window_params = [{transform_indices = @transform_0, window_bounds = array<i64: 1, 1, 4, 512>}, {pipeline_mode = #tpu.pipeline_mode<synchronous>, transform_indices = @transform_1, window_bounds = array<i64: 8, 36>}, {pipeline_mode = #tpu.pipeline_mode<synchronous>, transform_indices = @transform_2, window_bounds = array<i64: 8, 1>}, {transform_indices = @transform_3, window_bounds = array<i64: 1, 8, 384>}]} {
    %c0 = arith.constant 0 : index
    %c0_0 = arith.constant 0 : index
    %c0_1 = arith.constant 0 : index
    %c0_2 = arith.constant 0 : index
    %0 = vector.load %arg1[%c0, %c0_0, %c0_1, %c0_2] : memref<1x1x4x512xbf16, #tpu.memory_space<vmem>>, vector<1x1x4x384xbf16>
    %1 = vector.shape_cast %0 : vector<1x1x4x384xbf16> to vector<4x384xbf16>
    %c0_3 = arith.constant 0 : index
    %c0_4 = arith.constant 0 : index
    %2 = vector.load %arg5[%c0_3, %c0_4] : memref<36x384xbf16, #tpu.memory_space<vmem>>, vector<4x384xbf16>
    tpu.vector_store %arg5[%c0_3, %c0_4], %1 {strides = array<i32>} : memref<36x384xbf16, #tpu.memory_space<vmem>>, vector<4x384xbf16>,
    %c0_5 = arith.constant 0 : index
    %c0_6 = arith.constant 0 : index
    %c0_7 = arith.constant 0 : index
    %c1 = arith.constant 1 : index
    %3 = vector.load %arg1[%c0_5, %c0_6, %c0_7, %c1] : memref<1x1x4x512xbf16, #tpu.memory_space<vmem>>, vector<1x1x4x384xbf16>
    %4 = vector.shape_cast %3 : vector<1x1x4x384xbf16> to vector<4x384xbf16>
    %c4 = arith.constant 4 : index
    %c0_8 = arith.constant 0 : index
    %5 = vector.load %arg5[%c4, %c0_8] : memref<36x384xbf16, #tpu.memory_space<vmem>>, vector<4x384xbf16>
    tpu.vector_store %arg5[%c4, %c0_8], %4 {strides = array<i32>} : memref<36x384xbf16, #tpu.memory_space<vmem>>, vector<4x384xbf16>,
    %c0_9 = arith.constant 0 : index
    %c0_10 = arith.constant 0 : index
    %c0_11 = arith.constant 0 : index
    %c2 = arith.constant 2 : index
    %6 = vector.load %arg1[%c0_9, %c0_10, %c0_11, %c2] : memref<1x1x4x512xbf16, #tpu.memory_space<vmem>>, vector<1x1x4x384xbf16>
    %7 = vector.shape_cast %6 : vector<1x1x4x384xbf16> to vector<4x384xbf16>
    %c8 = arith.constant 8 : index
    %c0_12 = arith.constant 0 : index
    %8 = vector.load %arg5[%c8, %c0_12] : memref<36x384xbf16, #tpu.memory_space<vmem>>, vector<4x384xbf16>
    tpu.vector_store %arg5[%c8, %c0_12], %7 {strides = array<i32>} : memref<36x384xbf16, #tpu.memory_space<vmem>>, vector<4x384xbf16>,
    %c0_13 = arith.constant 0 : index
    %c0_14 = arith.constant 0 : index
    %c0_15 = arith.constant 0 : index
    %c18 = arith.constant 18 : index
    %9 = vector.load %arg1[%c0_13, %c0_14, %c0_15, %c18] : memref<1x1x4x512xbf16, #tpu.memory_space<vmem>>, vector<1x1x4x384xbf16>
    %10 = vector.shape_cast %9 : vector<1x1x4x384xbf16> to vector<4x384xbf16>
    %c12 = arith.constant 12 : index
    %c0_16 = arith.constant 0 : index
    %11 = vector.load %arg5[%c12, %c0_16] : memref<36x384xbf16, #tpu.memory_space<vmem>>, vector<4x384xbf16>
    tpu.vector_store %arg5[%c12, %c0_16], %10 {strides = array<i32>} : memref<36x384xbf16, #tpu.memory_space<vmem>>, vector<4x384xbf16>,
    %c0_17 = arith.constant 0 : index
    %c0_18 = arith.constant 0 : index
    %c0_19 = arith.constant 0 : index
    %c19 = arith.constant 19 : index
    %12 = vector.load %arg1[%c0_17, %c0_18, %c0_19, %c19] : memref<1x1x4x512xbf16, #tpu.memory_space<vmem>>, vector<1x1x4x384xbf16>
    %13 = vector.shape_cast %12 : vector<1x1x4x384xbf16> to vector<4x384xbf16>
    %c16 = arith.constant 16 : index
    %c0_20 = arith.constant 0 : index
    %14 = vector.load %arg5[%c16, %c0_20] : memref<36x384xbf16, #tpu.memory_space<vmem>>, vector<4x384xbf16>
    tpu.vector_store %arg5[%c16, %c0_20], %13 {strides = array<i32>} : memref<36x384xbf16, #tpu.memory_space<vmem>>, vector<4x384xbf16>,
    %c0_21 = arith.constant 0 : index
    %c0_22 = arith.constant 0 : index
    %c0_23 = arith.constant 0 : index
    %c20 = arith.constant 20 : index
    %15 = vector.load %arg1[%c0_21, %c0_22, %c0_23, %c20] : memref<1x1x4x512xbf16, #tpu.memory_space<vmem>>, vector<1x1x4x384xbf16>
    %16 = vector.shape_cast %15 : vector<1x1x4x384xbf16> to vector<4x384xbf16>
    %c20_24 = arith.constant 20 : index
    %c0_25 = arith.constant 0 : index
    %17 = vector.load %arg5[%c20_24, %c0_25] : memref<36x384xbf16, #tpu.memory_space<vmem>>, vector<4x384xbf16>
    tpu.vector_store %arg5[%c20_24, %c0_25], %16 {strides = array<i32>} : memref<36x384xbf16, #tpu.memory_space<vmem>>, vector<4x384xbf16>,
    %c0_26 = arith.constant 0 : index
    %c0_27 = arith.constant 0 : index
    %c0_28 = arith.constant 0 : index
    %c36 = arith.constant 36 : index
    %18 = vector.load %arg1[%c0_26, %c0_27, %c0_28, %c36] : memref<1x1x4x512xbf16, #tpu.memory_space<vmem>>, vector<1x1x4x384xbf16>
    %19 = vector.shape_cast %18 : vector<1x1x4x384xbf16> to vector<4x384xbf16>
    %c24 = arith.constant 24 : index
    %c0_29 = arith.constant 0 : index
    %20 = vector.load %arg5[%c24, %c0_29] : memref<36x384xbf16, #tpu.memory_space<vmem>>, vector<4x384xbf16>
    tpu.vector_store %arg5[%c24, %c0_29], %19 {strides = array<i32>} : memref<36x384xbf16, #tpu.memory_space<vmem>>, vector<4x384xbf16>,
    %c0_30 = arith.constant 0 : index
    %c0_31 = arith.constant 0 : index
    %c0_32 = arith.constant 0 : index
    %c37 = arith.constant 37 : index
    %21 = vector.load %arg1[%c0_30, %c0_31, %c0_32, %c37] : memref<1x1x4x512xbf16, #tpu.memory_space<vmem>>, vector<1x1x4x384xbf16>
    %22 = vector.shape_cast %21 : vector<1x1x4x384xbf16> to vector<4x384xbf16>
    %c28 = arith.constant 28 : index
    %c0_33 = arith.constant 0 : index
    %23 = vector.load %arg5[%c28, %c0_33] : memref<36x384xbf16, #tpu.memory_space<vmem>>, vector<4x384xbf16>
    tpu.vector_store %arg5[%c28, %c0_33], %22 {strides = array<i32>} : memref<36x384xbf16, #tpu.memory_space<vmem>>, vector<4x384xbf16>,
    %c0_34 = arith.constant 0 : index
    %c0_35 = arith.constant 0 : index
    %c0_36 = arith.constant 0 : index
    %c38 = arith.constant 38 : index
    %24 = vector.load %arg1[%c0_34, %c0_35, %c0_36, %c38] : memref<1x1x4x512xbf16, #tpu.memory_space<vmem>>, vector<1x1x4x384xbf16>
    %25 = vector.shape_cast %24 : vector<1x1x4x384xbf16> to vector<4x384xbf16>
    %c32 = arith.constant 32 : index
    %c0_37 = arith.constant 0 : index
    %26 = vector.load %arg5[%c32, %c0_37] : memref<36x384xbf16, #tpu.memory_space<vmem>>, vector<4x384xbf16>
    tpu.vector_store %arg5[%c32, %c0_37], %25 {strides = array<i32>} : memref<36x384xbf16, #tpu.memory_space<vmem>>, vector<4x384xbf16>,
    %c0_38 = arith.constant 0 : index
    %c0_39 = arith.constant 0 : index
    %27 = vector.load %arg2[%c0_38, %c0_39] : memref<8x36xbf16, #tpu.memory_space<vmem>>, vector<8x36xbf16>
    %c0_40 = arith.constant 0 : index
    %c0_41 = arith.constant 0 : index
    %28 = vector.load %arg5[%c0_40, %c0_41] : memref<36x384xbf16, #tpu.memory_space<vmem>>, vector<36x384xbf16>
    %cst = arith.constant dense<0.000000e+00> : vector<8x384xf32>
    %29 = tpu.matmul %27, %28, %cst {dimension_numbers = #tpu.dot_dimension_numbers<[1], [0], [0], [1], [0, 0, 1, 1], [], []>} : vector<8x36xbf16>, vector<36x384xbf16>, vector<8x384xf32> -> vector<8x384xf32>
    %c0_42 = arith.constant 0 : index
    %c0_43 = arith.constant 0 : index
    %30 = vector.load %arg3[%c0_42, %c0_43] : memref<8x1xf32, #tpu.memory_space<vmem>>, vector<8x1xf32>
    %31 = vector.broadcast %30 : vector<8x1xf32> to vector<8x384xf32>
    %32 = arith.addf %29, %31 : vector<8x384xf32>
    %33 = arith.truncf %32 : vector<8x384xf32> to vector<8x384xbf16>
    %c0_44 = arith.constant 0 : index
    %c0_45 = arith.constant 0 : index
    %c0_46 = arith.constant 0 : index
    %34 = vector.load %arg4[%c0_44, %c0_45, %c0_46] : memref<1x8x384xbf16, #tpu.memory_space<vmem>>, vector<1x8x384xbf16>
    %35 = vector.shape_cast %34 : vector<1x8x384xbf16> to vector<8x384xbf16>
    %36 = vector.shape_cast %33 : vector<8x384xbf16> to vector<1x8x384xbf16>
    tpu.vector_store %arg4[%c0_44, %c0_45, %c0_46], %36 {strides = array<i32>} : memref<1x8x384xbf16, #tpu.memory_space<vmem>>, vector<1x8x384xbf16>,
    return
  }
  func.func @transform_0(%arg0: i32) -> (i32, i32, i32, i32) {
    %c0_i32 = arith.constant 0 : i32
    %c0_i32_0 = arith.constant 0 : i32
    %c0_i32_1 = arith.constant 0 : i32
    %c0_i32_2 = arith.constant 0 : i32
    return %arg0, %c0_i32, %c0_i32_0, %c0_i32_1 : i32, i32, i32, i32
  }
  func.func @transform_1(%arg0: i32) -> (i32, i32) {
    %c0_i32 = arith.constant 0 : i32
    %c0_i32_0 = arith.constant 0 : i32
    %c0_i32_1 = arith.constant 0 : i32
    return %c0_i32, %c0_i32_0 : i32, i32
  }
  func.func @transform_2(%arg0: i32) -> (i32, i32) {
    %c0_i32 = arith.constant 0 : i32
    %c0_i32_0 = arith.constant 0 : i32
    %c0_i32_1 = arith.constant 0 : i32
    return %c0_i32, %c0_i32_0 : i32, i32
  }
  func.func @transform_3(%arg0: i32) -> (i32, i32, i32) {
    %c0_i32 = arith.constant 0 : i32
    %c0_i32_0 = arith.constant 0 : i32
    %c0_i32_1 = arith.constant 0 : i32
    return %arg0, %c0_i32, %c0_i32_0 : i32, i32, i32
  }
}

</mosaic_0001>

<bundles_post_ra>
// kernel: tpu_custom_call.1
= control target key start
LH: loop header
LB: loop body
LE: loop exit
PB: predicated region body
PF: predicated region fallthrough
CT: control target
= control target key end

     0   :  { %8 = vsyncpa [#allocation4], 0  ;;  %s1145_s0 = inlined_call_operand.hbm [shape: bf16[2,1,4,512], index: 0, kind: input, shape index: {}]   ;;  %s1146_s1 = inlined_call_operand.vmem [shape: bf16[8,36], index: 1, kind: input, shape index: {}]   ;;  %s1147_s2 = inlined_call_operand.vmem [shape: f32[8,1], index: 2, kind: input, shape index: {}]   ;;  %s1148_s3 = inlined_call_operand.hbm [shape: bf16[2,8,384], index: 3, kind: output, shape index: {}]  }
   0x1   :  { %10 = vsyncpa [#allocation4 + $0x1], 0 }
   0x2   :  { %11 = vsyncpa [#allocation5], 0 }
   0x3   :  { %13 = vsyncpa [#allocation5 + $0x1], 0  ;;  %s961_s12 = smov 0   ;;  %s963_s13 = smov 0  }
   0x4   :  { %s965_s14 = smov 0   ;;  %s967_s15 = smov 0  }
   0x5 LB: > { %s982_s16 = sadd.s32 4294967295, %s925_s15   ;;  %s710_s17 = sadd.s32 4294967294, %s925_s15   ;;  %s925_s15 = sphi %s967_s15, %s1163_s15   ;;  %s921_s14 = sphi %s965_s14, %s1162_s14   ;;  %s917_s13 = sphi %s963_s13, %s1161_s13   ;;  %s913_s12 = sphi %s961_s12, %s1160_s12  }
   0x6   : > { %s986_s18 = sadd.s32 1, %s925_s15   ;;  %s26_s19 = sadd.s32 1, %s921_s14 }
   0x7   : > { %s23_s20 = ssub.s32 %s925_s15, %s986_s18  ;;  %p33_p0 = scmp.ne.s32.totalorder %s921_s14, %s917_s13 }
   0x8   : > { %p24_p1 = scmp.eq.s32.totalorder %s23_s20, 0  ;;  %p34_p2 = scmp.eq.s32.totalorder %s925_s15, 0 }
   0x9   : > { %p39_p3 = scmp.ne.s32.totalorder %s917_s13, %s913_s12  ;;  %p40_p4 = scmp.eq.s32.totalorder %s982_s16, 0 }
   0xa   : > { %s998_s21 = scalar_select %p24_p1, %s921_s14, %s26_s19  }
   0xb   : > { %p1000_p5 = por %p34_p2, %p33_p0  ;;  %p1004_p6 = por %p40_p4, %p39_p3 }
   0xc   : > { %p105_p7 = scmp.eq.s32.totalorder %s982_s16, 1  ;;  %p111_p8 = scmp.eq.s32.totalorder %s710_s17, 1 }
   0xd   : > { %p768_p10 = scmp.lt.s32.totalorder %s925_s15, 2  ;;  %s137_s26 = sand.u32 1, %s921_s14  }
   0xe   : > { %p1011_p11 = por %p105_p7, %p33_p0  ;;  %p1015_p12 = por %p111_p8, %p39_p3 }
   0xf   : > { %s737_s27 = sshll.u32 %s925_s15, 7  ;;  %s713_s28 = sshll.u32 %s137_s26, 3 }
  0x10   : > { %s1152_s24 = scalar_select %p1011_p11, 1, 0 }
  0x11   : > { %s1153_s25 = scalar_select %p1015_p12, 1, 0 }
  0x12   : > { %s1024_s4 = scalar_lea.hbm %s1145_s0, %s737_s27  ;;  %s141_s5 = scalar_lea.vmem [#allocation3], %s713_s28 }
  0x13   : > { %s149_s6 = sshll.u32 %s141_s5, 4  ;;  %p1028_p13 = pnand %p768_p10, %p1000_p5  ;;  %s1032_s6 = int_to_ptr.vmem [resolvable:$true] %s149_s6 }
  0x14   : > { %s138_s8 = scalar_lea.sflag [#allocation4], %s137_s26  ;;  %s829_s9 = scalar_lea.hbm %s1024_s4, 128 }
  0x15   : > { %p830_p2 = scmp.ne.s32.totalorder %s1024_s4, %s829_s9  ;;  %p831_p3 = pneg %p1028_p13 }
  0x16   : > { %s834_s17 = scalar_lea.hbm %s1145_s0, 256  ;;  %p835_p5 = scmp.lt.u32.totalorder %s1024_s4, %s1145_s0 }
  0x17   : > { %p832_p4 = pnand %p831_p3, %p830_p2  ;;  %p836_p8 = scmp.lt.u32.totalorder %s834_s17, %s829_s9 }
  0x18   : > { %p838_p9 = scmp.lt.u32.totalorder %s829_s9, %s1024_s4 }
  0x19   : > { %p833_p7 = pneg %p832_p4  ;;  %p837_p10 = por %p836_p8, %p835_p5 }
  0x1b   : > { %p839_p0 = por %p838_p9, %p837_p10 }
  0x1d   : > { %p840_p1 = pnand %p839_p0, %p833_p7 }
  0x1f   : > { %843 = shalt.err (!%p840_p1)
}
  0x20   : > { %s844_s22 = scalar_lea.vmem %s1032_s6, 128  ;;  %s927_s26 = smov [#allocation3]  }
  0x21   : > { %p845_p2 = scmp.ne.s32.totalorder %s1032_s6, %s844_s22  ;;  %s849_s27 = sshll.u32 %s927_s26, 4  ;;  %s850_s27 = int_to_ptr.vmem [resolvable:$false] %s849_s27 }
  0x22   : > { %s851_s28 = scalar_lea.vmem %s850_s27, 256  ;;  %p852_p11 = scmp.lt.s32.totalorder %s1032_s6, %s850_s27 }
  0x23   : > { %p847_p4 = pnand %p845_p2, %p831_p3  ;;  %p853_p5 = scmp.lt.s32.totalorder %s851_s28, %s844_s22 }
  0x25   : > { %p848_p12 = pneg %p847_p4  ;;  %p854_p8 = por %p853_p5, %p852_p11 }
  0x27   : > { %p855_p9 = pnand %p854_p8, %p848_p12 }
  0x29   : > { %858 = shalt.err (!%p855_p9)
}
  0x2a   : > { %763 = dma.hbm_to_vmem [thread:$0]  (!%p1028_p13), %s1024_s4, 128, %s1032_s6, %s138_s8  }
  0x2b   : > { %p1155_p0 = scmp.lt.s32.totalorder %s925_s15, 3  ;;  %p1156_p1 = scmp.ge.s32.totalorder %s925_s15, 1 }
  0x2d   : > { %p155_p3 = pnand %p1156_p1, %p1155_p0 }
  0x2e   : > { %s1066_s29 = sand.u32 (!%p155_p3), 1, %s917_s13  }
  0x2f   : > { %158 = sbr.rel (%p155_p3) target bundleno = 456 (0x1c8), region = 32  ;;  %s717_s30 = sshll.u32 (!%p155_p3), %s1066_s29, 3 }
  0x30   : > { %s161_s5 = scalar_lea.sflag (!%p155_p3), [#allocation4], %s1066_s29  ;;  %s164_s9 = scalar_lea.vmem (!%p155_p3), [#allocation3], %s717_s30 }
  0x36   : > { %904 = dma.done.wait (%p1004_p6), %s161_s5, 128  }
  0x37   : > { %906 = vsyncadd (%p1004_p6), %s161_s5, 4294967168  ;;  %v215_v0 = vlaneseq  ;;  %v928_v1 = vmov 1983009808   ;;  %v241_v6 = vld [vmem:[%s164_s9] sm:$0xff]  ;;  %s929_s4 = smov 126   ;;  %s930_s6 = smov 127  }
  0x38   : > { %v213_v2 = vunpack.c.l.s4 %v928_v1  ;;  %v188_v7 = vld [vmem:[%s164_s9] sm:$0x3f]  ;;  %v243_v10 = vcombine.high %v241_v6, %v241_v6  ;;  %v211_v11 = vcombine.low %v241_v6, %v241_v6  ;;  %s931_s23 = smov 110   ;;  %s932_s7 = smov 109   ;;  %v933_v14 = vmov 0.0  }
  0x39   : > { %v216_v3 = vshrl.u32 %v215_v0, 7  ;;  %v190_v9 = vcombine.high %v188_v7, %v188_v7  ;;  %718 = vst.sshfl [vmem:[#allocation2] sm:$0xf pattern:$0x76325410] %v188_v7  ;;  %744 = vmatprep.subr.bf16.mxu1 %v933_v14  ;;  %s934_s8 = smov 108  }
  0x3a   : > { %v214_v4 = vunpack.c.0.s8 %v213_v2  ;;  %s935_s10 = smov 92   ;;  %s936_s11 = smov 91   ;;  %vm938_vm0 = vmmov 0   ;;  %v939_v15 = vmov 0   ;;  %v469_v16 = vld [vmem:[%s1147_s2] sm:$0xff]  ;;  %vm234_vm1 = vcmask 1039360  }
  0x3b   : > { %719 = vst.sshfl [vmem:[#allocation2 + $0x8] sm:$0x3 pattern:$0x76325410] %v190_v9  ;;  %s937_s17 = smov 90   ;;  %750 = vmatprep.mubr.msk.bf16.mxu1 %vm938_vm0, %v933_v14  ;;  %561 = vmatprep.mubr.bf16.mxu0 %v939_v15  ;;  %vm296_vm2 = vcmask 900096  }
  0x3c   : > { %v217_v5 = vsub.s32 %v214_v4, %v216_v3  ;;  %814 = vset.pattern.permute.xlu0 %v939_v15  ;;  %vm232_vm3 = vcmask 1043456   ;;  %vm265_vm4 = vcmask 1031168   ;;  %vm327_vm5 = vcmask 891904   ;;  %s754_s27 = smul.u32 12, %s1066_s29  ;;  %p1157_p11 = scmp.ne.s32.totalorder %s1152_s24, 0 }
  0x3d   : > { %vm358_vm6 = vcmask 883712   ;;  %vm389_vm7 = vcmask 752640   ;;  %vm420_vm8 = vcmask 744448   ;;  %vm451_vm9 = vcmask 736256   ;;  %s755_s28 = smul.u32 192, %s982_s16  ;;  %s626_s16 = scalar_lea.sflag [#allocation5], %s1066_s29 }
  0x3e   : > { %v250_v8 = vrot.slane %v241_v6, %v217_v5  ;;  %v257_v12 = vrot.slane %v243_v10, %v217_v5  ;;  %v218_v13 = vrot.slane %v211_v11, %v217_v5  ;;  %vm519_vm10 = vcmask 1041408   ;;  %s186_s30 = scalar_lea.vmem [#allocation6], %s754_s27 }
  0x3f   : > { %vm515_vm11 = vcmask 293888   ;;  %s640_s5 = sshll.u32 %s186_s30, 4  ;;  %s1103_s5 = int_to_ptr.vmem [resolvable:$true] %s640_s5 }
  0x40   : > { %258 = vrot.lane.b32.xlu1 %v250_v8, %s929_s4  ;;  %228 = vrot.lane.b32.xlu0 %v250_v8, %s930_s6 }
  0x44   : > { %291 = vrot.lane.b32.xlu1 %v250_v8, %s931_s23  ;;  %320 = vrot.lane.b32.xlu0 %v250_v8, %s932_s7 }
  0x48   : > { %260 = vrot.lane.b32.xlu1 %v257_v12, %s929_s4  ;;  %226 = vrot.lane.b32.xlu0 %v218_v13, %s930_s6  ;;  %s1101_s6 = scalar_lea.hbm %s1148_s3, %s755_s28 }
  0x4c   : > { %322 = vrot.lane.b32.xlu1 %v257_v12, %s932_s7  ;;  %289 = vrot.lane.b32.xlu0 %v218_v13, %s931_s23  ;;  %s859_s23 = scalar_lea.vmem %s1103_s5, 192  ;;  %s940_s7 = smov [#allocation6]  }
  0x4d   : > { %p860_p6 = scmp.ne.s32.totalorder %s1103_s5, %s859_s23 }
  0x4f   : > { %p861_p12 = pnand %p860_p6, %p1157_p11 }
  0x50   : > { %353 = vrot.lane.b32.xlu1 %v250_v8, %s934_s8  ;;  %351 = vrot.lane.b32.xlu0 %v218_v13, %s934_s8  ;;  %s863_s8 = sshll.u32 %s940_s7, 4  ;;  %s864_s8 = int_to_ptr.vmem [resolvable:$false] %s863_s8 }
  0x51   : > { %p862_p13 = pneg %p861_p12  ;;  %p866_p7 = scmp.lt.s32.totalorder %s1103_s5, %s864_s8 }
  0x54   : > { %384 = vrot.lane.b32.xlu1 %v257_v12, %s935_s10  ;;  %382 = vrot.lane.b32.xlu0 %v250_v8, %s935_s10  ;;  %s865_s10 = scalar_lea.vmem %s864_s8, 384 }
  0x55   : > { %p867_p10 = scmp.lt.s32.totalorder %s865_s10, %s859_s23 }
  0x57   : > { %p868_p2 = por %p867_p10, %p866_p7 }
  0x58   : > { %415 = vrot.lane.b32.xlu1 %v250_v8, %s936_s11  ;;  %413 = vrot.lane.b32.xlu0 %v218_v13, %s936_s11 }
  0x59   : > { %p869_p4 = pnand %p868_p2, %p862_p13 }
  0x5c   : > { %446 = vrot.lane.b32.xlu1 %v257_v12, %s937_s17  ;;  %444 = vrot.lane.b32.xlu0 %v250_v8, %s937_s17 }
  0x60   : > { %472 = vperm.xlu0 %814, %v469_v16  }
  0xb2   : > { %v259_v17 = vpop.permute.xlu1 %258  ;;  %v229_v18 = vpop.permute.xlu0 %228 }
  0xb3   : > { %v231_v19 = vrot.slane %v229_v18, 4  ;;  %v262_v27 = vrot.slane %v259_v17, 4 }
  0xb5   : > { %v236_v20 = vsel %vm234_vm1, %v229_v18, %v231_v19 }
  0xb6   : > { %240 = vst [vmem:[#allocation2 + $0x8] sm:$0xc] %v236_v20  ;;  %v292_v21 = vpop.permute.xlu1 %291  ;;  %v321_v22 = vpop.permute.xlu0 %320 }
  0xb7   : > { %v294_v23 = vrot.slane %v292_v21, 4  ;;  %v324_v37 = vrot.slane %v321_v22, 4 }
  0xb9   : > { %v298_v24 = vsel %vm296_vm2, %v292_v21, %v294_v23  ;;  %v458_v21 = vld [vmem:[%s1146_s1] sm:$0xf] }
  0xba   : > { %302 = vst [vmem:[#allocation2 + $0x14] sm:$0xc] %v298_v24  ;;  %v261_v25 = vpop.permute.xlu1 %260  ;;  %v227_v26 = vpop.permute.xlu0 %226 }
  0xbb   : > { %v263_v28 = vrot.slane %v261_v25, 4  ;;  %v230_v29 = vrot.slane %v227_v26, 4 }
  0xbd   : > { %v264_v30 = vsel %vm232_vm3, %v262_v27, %v263_v28  ;;  %v267_v31 = vsel %vm265_vm4, %v261_v25, %v263_v28  ;;  %v233_v32 = vsel %vm232_vm3, %v230_v29, %v231_v19 }
  0xbe   : > { %v266_v33 = vsel %vm265_vm4, %v259_v17, %v264_v30  ;;  %271 = vst [vmem:[#allocation2 + $0x14] sm:$0x3] %v267_v31  ;;  %v235_v34 = vsel %vm234_vm1, %v227_v26, %v233_v32  ;;  %v323_v35 = vpop.permute.xlu1 %322  ;;  %v290_v36 = vpop.permute.xlu0 %289 }
  0xbf   : > { %270 = vst [vmem:[#allocation2 + $0xc] sm:$0x33] %v266_v33  ;;  %239 = vst [vmem:[#allocation2] sm:$0xcc] %v235_v34  ;;  %v325_v38 = vrot.slane %v323_v35, 4  ;;  %v293_v39 = vrot.slane %v290_v36, 4 }
  0xc1   : > { %v326_v40 = vsel %vm232_vm3, %v324_v37, %v325_v38  ;;  %v329_v41 = vsel %vm327_vm5, %v323_v35, %v325_v38  ;;  %v295_v42 = vsel %vm232_vm3, %v293_v39, %v294_v23 }
  0xc2   : > { %v328_v43 = vsel %vm327_vm5, %v321_v22, %v326_v40  ;;  %333 = vst [vmem:[#allocation2 + $0x20] sm:$0x3] %v329_v41  ;;  %v297_v44 = vsel %vm296_vm2, %v290_v36, %v295_v42  ;;  %v354_v45 = vpop.permute.xlu1 %353  ;;  %v352_v46 = vpop.permute.xlu0 %351 }
  0xc3   : > { %332 = vst [vmem:[#allocation2 + $0x18] sm:$0x33] %v328_v43  ;;  %301 = vst [vmem:[#allocation2 + $0xc] sm:$0xcc] %v297_v44  ;;  %v356_v47 = vrot.slane %v354_v45, 4  ;;  %v355_v48 = vrot.slane %v352_v46, 4 }
  0xc5   : > { %v360_v49 = vsel %vm358_vm6, %v354_v45, %v356_v47  ;;  %v357_v50 = vsel %vm232_vm3, %v355_v48, %v356_v47  ;;  %v818_v51 = vld [vmem:[#allocation2 + $0x8] ss:$12 sps:$4 sm:$0xff]  }
  0xc6   : > { %364 = vst [vmem:[#allocation2 + $0x20] sm:$0xc] %v360_v49  ;;  %v359_v52 = vsel %vm358_vm6, %v352_v46, %v357_v50  ;;  %v385_v53 = vpop.permute.xlu1 %384  ;;  %v383_v54 = vpop.permute.xlu0 %382  ;;  %745 = vmatpush3.bf16.msra.mxu1 %v818_v51 }
  0xc7   : > { %363 = vst [vmem:[#allocation2 + $0x18] sm:$0xcc] %v359_v52  ;;  %v387_v55 = vrot.slane %v385_v53, 4  ;;  %v386_v56 = vrot.slane %v383_v54, 4  ;;  %746 = vmatprep.subr.bf16.mxu1 %v933_v14 }
  0xc9   : > { %v391_v57 = vsel %vm389_vm7, %v385_v53, %v387_v55  ;;  %v388_v58 = vsel %vm232_vm3, %v386_v56, %v387_v55 }
  0xca   : > { %395 = vst [vmem:[#allocation2 + $0x2c] sm:$0x3] %v391_v57  ;;  %v390_v59 = vsel %vm389_vm7, %v383_v54, %v388_v58  ;;  %v416_v60 = vpop.permute.xlu1 %415  ;;  %v414_v61 = vpop.permute.xlu0 %413  ;;  %v819_v62 = vld [vmem:[#allocation2 + $0x4] ss:$12 sps:$4 sm:$0xff]   ;;  %v821_v63 = vld [vmem:[#allocation2] ss:$12 sps:$4 sm:$0xff]  }
  0xcb   : > { %394 = vst [vmem:[#allocation2 + $0x24] sm:$0x33] %v390_v59  ;;  %v418_v0 = vrot.slane %v416_v60, 4  ;;  %v417_v1 = vrot.slane %v414_v61, 4  ;;  %529 = vmatprep.subr.bf16.mxu0 %v819_v62 }
  0xcc   : > { %530 = vmatpush1.bf16.msra.mxu0 %v821_v63 }
  0xcd   : > { %v422_v2 = vsel %vm420_vm8, %v416_v60, %v418_v0  ;;  %v419_v3 = vsel %vm232_vm3, %v417_v1, %v418_v0 }
  0xce   : > { %426 = vst [vmem:[#allocation2 + $0x2c] sm:$0xc] %v422_v2  ;;  %v421_v4 = vsel %vm420_vm8, %v414_v61, %v419_v3  ;;  %v447_v5 = vpop.permute.xlu1 %446  ;;  %v445_v6 = vpop.permute.xlu0 %444 }
  0xcf   : > { %425 = vst [vmem:[#allocation2 + $0x24] sm:$0xcc] %v421_v4  ;;  %v449_v7 = vrot.slane %v447_v5, 4  ;;  %v448_v8 = vrot.slane %v445_v6, 4 }
  0xd1   : > { %v453_v9 = vsel %vm451_vm9, %v447_v5, %v449_v7  ;;  %v450_v10 = vsel %vm232_vm3, %v448_v8, %v449_v7 }
  0xd2   : > { %457 = vst [vmem:[#allocation2 + $0x38] sm:$0x3] %v453_v9  ;;  %v452_v11 = vsel %vm451_vm9, %v445_v6, %v450_v10 }
  0xd3   : > { %456 = vst [vmem:[#allocation2 + $0x30] sm:$0x33] %v452_v11 }
  0xd5   : > { %v822_v12 = vld [vmem:[#allocation2 + $0x20] ss:$12 sps:$4 sm:$0xff]  }
  0xd6   : > { %v823_v13 = vld [vmem:[#allocation2 + $0x1c] ss:$12 sps:$4 sm:$0xff]   ;;  %v825_v15 = vld [vmem:[#allocation2 + $0x18] ss:$12 sps:$4 sm:$0xff]   ;;  %747 = vmatpush3.bf16.msra.mxu1 %v822_v12 }
  0xd7   : > { %531 = vmatprep.subr.bf16.mxu0 %v823_v13  ;;  %748 = vmatprep.subr.bf16.mxu1 %v933_v14 }
  0xd8   : > { %532 = vmatpush1.bf16.msra.mxu0 %v825_v15 }
  0xd9   : > { %v827_v16 = vld [vmem:[#allocation2 + $0x38] ss:$0 sps:$4 sm:$0x33]  }
  0xda   : > { %v467_v17 = vld [vmem:[#allocation2 + $0x30] sm:$0x33]  ;;  %v527_v19 = vsel %vm519_vm10, %v827_v16, 0 }
  0xdb   : > { %v727_v18 = vcombine.high %v467_v17, %v467_v17  ;;  %v726_v20 = vcombine.low %v467_v17, %v467_v17  ;;  %749 = vmatpush3.bf16.msra.mxu1 %v527_v19 }
  0xdd   : > { %729 = vmatprep.subr.msk.bf16.mxu0 %vm519_vm10, %v727_v18  ;;  %v521_v22 = vsel %vm519_vm10, %v726_v20, 0 }
  0xde   : > { %534 = vmatpush1.bf16.msra.mxu0 %v521_v22  ;;  %751 = vmatmul.mubr.msk.bf16.vlgmr.msra.gmra.mrb[0].mxu1 %vm515_vm11, %v458_v21 }
  0xdf   : > { %v473_v14 = vpop.permute.xlu0 %472 }
  0xe1   : > { %730 = vmatmul.mubr.msk.bf16.vlgmr.msra.gmra.mrb[0].mxu0 %vm515_vm11, %v458_v21 }
 0x1b1   : > { %v604_v23 = vpop.f32.mrb[0].mxu1 }
 0x1b2   : > { %v605_v24 = vadd.f32 %v604_v23, %v473_v14  ;;  %v752_v25 = vpop.f32.mrb[1].mxu1 }
 0x1b3   : > { %v607_v27 = vpop.f32.mrb[2].mxu1 }
 0x1b4   : > { %v563_v26 = vpop.f32.mrb[0].mxu0  ;;  %v739_v28 = vpack.c.bf16 %v605_v24, %v605_v24  ;;  %v753_v31 = vpop.f32.mrb[3].mxu1 }
 0x1b5   : > { %v564_v29 = vadd.f32 %v563_v26, %v473_v14  ;;  %v565_v30 = vpop.f32.mrb[1].mxu0 }
 0x1b6   : > { %v566_v32 = vadd.f32 %v565_v30, %v473_v14  ;;  %v567_v33 = vpop.f32.mrb[2].mxu0  ;;  %624 = vst [vmem:[%s186_s30 + $0x8] sm:$0xf] %v739_v28 }
 0x1b7   : > { %v568_v34 = vpop.f32.mrb[3].mxu0 }
 0x1b8   : > { %v738_v35 = vpack.c.bf16 %v566_v32, %v564_v29 }
 0x1ba   : > { %623 = vst [vmem:[%s186_s30] sm:$0xff] %v738_v35 }
 0x1bb   : > { %872 = shalt.err (!%p869_p4)
}
 0x1bc   : > { %s873_s29 = scalar_lea.hbm %s1101_s6, 192  ;;  %s877_s19 = scalar_lea.hbm %s1148_s3, 384 }
 0x1bd   : > { %p874_p5 = scmp.ne.s32.totalorder %s1101_s6, %s873_s29  ;;  %p878_p0 = scmp.lt.u32.totalorder %s1101_s6, %s1148_s3 }
 0x1be   : > { %p879_p1 = scmp.lt.u32.totalorder %s877_s19, %s873_s29  ;;  %p881_p6 = scmp.lt.u32.totalorder %s873_s29, %s1101_s6 }
 0x1bf   : > { %p875_p8 = pnand %p874_p5, %p1157_p11 }
 0x1c0   : > { %p880_p3 = por %p879_p1, %p878_p0 }
 0x1c1   : > { %p876_p9 = pneg %p875_p8 }
 0x1c2   : > { %p882_p12 = por %p881_p6, %p880_p3 }
 0x1c4   : > { %p883_p13 = pnand %p882_p12, %p876_p9 }
 0x1c6   : > { %886 = shalt.err (!%p883_p13)
}
 0x1c7   : > { %758 = dma.vmem_to_hbm [thread:$0]  (%p1157_p11), %s1103_s5, 192, %s1101_s6, %s626_s16  }
 0x1c8 PF: > { %s652_s26 = sand.u32 1, %s913_s12   ;;  %p1158_p7 = scmp.ne.s32.totalorder %s1153_s25, 0 }
 0x1c9   : > { %p1159_p10 = scmp.ge.s32.totalorder %s925_s15, 2  ;;  %s653_s27 = scalar_lea.sflag [#allocation5], %s652_s26 }
 0x1cb   : > { %p765_p2 = pnand %p1159_p10, %p1158_p7 }
 0x1cd   : > { %908 = dma.done.wait (!%p765_p2), %s653_s27, 192  }
 0x1ce   : > { %910 = vsyncadd (!%p765_p2), %s653_s27, 4294967104  ;;  %p16_p4 = scmp.ge.s32.totalorder %s986_s18, 4   ;;  %s1160_s12 = smov %s917_s13 }
 0x1cf   : > { %s1161_s13 = smov %s921_s14  ;;  %s1162_s14 = smov %s998_s21 }
 0x1d0   : > { %s1163_s15 = smov %s986_s18  ;;  %18 = sbr.rel (!%p16_p4) target bundleno = 5 (0x5), region = 77 }
 0x1d7   :  { %658 = vsyncpa [#allocation4], 1 }
 0x1d8   :  { %660 = vsyncpa [#allocation4 + $0x1], 1 }
 0x1d9   :  { %661 = vsyncpa [#allocation5], 1 }
 0x1da   :  { %663 = vsyncpa [#allocation5 + $0x1], 1 }

</bundles_post_ra>
